<compile_context>
chip_gen: v5e
topology: v5e:2x2
jax: 0.10.0
libtpu: 0.0.40
codegen_flags: <defaults>
</compile_context>

<pallas_src>
import functools

import jax
import jax.numpy as jnp
from jax import lax
from jax.experimental import pallas as pl
from jax.experimental.pallas import tpu as pltpu

_LANES = 128              # batch tile along the lane axis
_NEG_SENTINEL = -1.0e30   # log-hazard sentinel for empty bank slots (exp -> 0)


# ----------------------------------------------------------------------------
# Linear(D, 1) forward: o[1, n] = sum_d x[d, n] * w[d] + b      (VPU + XLU only)
# ----------------------------------------------------------------------------
def _linear_kernel(xt_ref, w_ref, b_ref, o_ref):
    # xt: (D, BN) VMEM, w: (D, 1) VMEM (resident), b: (1, 1) SMEM, o: (1, BN)
    o_ref[...] = (
        jnp.sum(xt_ref[...] * w_ref[...], axis=0, keepdims=True) + b_ref[0, 0]
    )


def linear_forward(x, w, b):
    """x: (N, D), w: (D, 1), b: (1, 1) -> lane-major estimates (1, N)."""
    n, d = x.shape
    n_pad = pl.cdiv(n, _LANES) * _LANES
    xt = x.T                                           # (D, N): lane-dense output
    if n_pad != n:
        xt = jnp.pad(xt, ((0, 0), (0, n_pad - n)))
    out = pl.pallas_call(
        _linear_kernel,
        out_shape=jax.ShapeDtypeStruct((1, n_pad), jnp.float32),
        grid=(n_pad // _LANES,),
        in_specs=[
            pl.BlockSpec((d, _LANES), lambda i: (0, i)),
            pl.BlockSpec((d, 1), lambda i: (0, 0)),            # weight resident
            pl.BlockSpec(memory_space=pltpu.MemorySpace.SMEM),  # bias scalar
        ],
        out_specs=pl.BlockSpec((1, _LANES), lambda i: (0, i)),
        compiler_params=pltpu.CompilerParams(dimension_semantics=("parallel",)),
    )(xt, w, b)
    return out[:, :n]


# ----------------------------------------------------------------------------
# Fused target forward + EMA:  theta_k <- m*theta_k + (1-m)*theta_q, then
# o = x @ theta_k'.  Updated params written back in place (aliased).
# ----------------------------------------------------------------------------
def _target_ema_kernel(xt_ref, wk_ref, bk_ref, wq_ref, bq_ref,
                       o_ref, wk_new_ref, bk_new_ref, *, rate):
    w_new = wk_ref[...] * rate + wq_ref[...] * (1.0 - rate)    # (D, 1)
    b_new = bk_ref[...] * rate + bq_ref[...] * (1.0 - rate)    # (1, 1)
    o_ref[...] = jnp.sum(xt_ref[...] * w_new, axis=0, keepdims=True) + b_new

    @pl.when(pl.program_id(0) == 0)
    def _():
        wk_new_ref[...] = w_new
        bk_new_ref[...] = b_new


def target_forward_and_ema(x, w_k, b_k, w_q, b_q, rate):
    n, d = x.shape
    n_pad = pl.cdiv(n, _LANES) * _LANES
    xt = x.T
    if n_pad != n:
        xt = jnp.pad(xt, ((0, 0), (0, n_pad - n)))
    est, w_k_new, b_k_new = pl.pallas_call(
        functools.partial(_target_ema_kernel, rate=float(rate)),
        out_shape=(
            jax.ShapeDtypeStruct((1, n_pad), jnp.float32),
            jax.ShapeDtypeStruct(w_k.shape, jnp.float32),
            jax.ShapeDtypeStruct(b_k.shape, jnp.float32),
        ),
        grid=(n_pad // _LANES,),
        in_specs=[
            pl.BlockSpec((d, _LANES), lambda i: (0, i)),
            pl.BlockSpec((d, 1), lambda i: (0, 0)),
            pl.BlockSpec((1, 1), lambda i: (0, 0)),
            pl.BlockSpec((d, 1), lambda i: (0, 0)),
            pl.BlockSpec((1, 1), lambda i: (0, 0)),
        ],
        out_specs=(
            pl.BlockSpec((1, _LANES), lambda i: (0, i)),
            pl.BlockSpec((d, 1), lambda i: (0, 0)),
            pl.BlockSpec((1, 1), lambda i: (0, 0)),
        ),
        # theta_k is semantically an in-place update: alias w_k/b_k onto outputs.
        input_output_aliases={1: 1, 2: 2},
        compiler_params=pltpu.CompilerParams(dimension_semantics=("arbitrary",)),
    )(xt, w_k, b_k, w_q, b_q)
    return est[:, :n], w_k_new, b_k_new


# ----------------------------------------------------------------------------
# Cox negative partial log-likelihood (no ties), lane-major, O(n) suffix scan
# ----------------------------------------------------------------------------
def _suffix_sum_lanes(e):
    """Inclusive suffix sum along the lane axis of a (1, L) f32 array."""
    L = e.shape[-1]
    lane = lax.broadcasted_iota(jnp.int32, e.shape, 1)
    s = e
    k = 1
    while k < L:                         # static: log2(L) unrolled XLU/VPU steps
        # shifted[i] = s[i + k]; mask out the wrap-around tail.
        shifted = pltpu.roll(s, shift=L - k, axis=1)
        shifted = jnp.where(lane + k < L, shifted, 0.0)
        s = s + shifted
        k *= 2
    return s


def _cox_kernel(hz_ref, ev_ref, o_ref):
    # hz, ev: (1, L) lane-major, sorted by time ascending; padded / empty-bank
    # entries carry hz = -1e30 (exp -> 0) and ev = 0 so they never contribute.
    hz = hz_ref[...]
    ev = ev_ref[...]
    m = jnp.max(hz, axis=1, keepdims=True)                 # (1, 1)
    e = jnp.exp(hz - m)                                    # (1, L)
    denom = _suffix_sum_lanes(e)                           # reverse cumsum, O(L)
    log_denom = jnp.log(denom) + m                         # (1, L)
    contrib = jnp.where(ev > 0.0, log_denom - hz, 0.0)     # -(hz - log_denom)
    n_events = jnp.sum(ev, axis=1, keepdims=True)          # (1, 1)
    total = jnp.sum(contrib, axis=1, keepdims=True)        # (1, 1)
    # mean over events; 0/0 -> nan matches torch nanmean over an empty selection
    o_ref[...] = total / n_events


def cox_neg_partial_log_likelihood(log_hz, event, time):
    """Negative partial log-likelihood (no ties), reduction='mean'.

    log_hz/event/time are lane-major (1, M) float32.  Empty bank slots must
    carry log_hz = -1e30 and event = 0 (their time is irrelevant).
    """
    m_tot = log_hz.shape[1]
    order = jnp.argsort(time[0])                 # glue: sort by time ascending
    hz_s = log_hz[:, order]
    ev_s = event[:, order]
    l_pad = pl.cdiv(m_tot, _LANES) * _LANES
    if l_pad != m_tot:
        hz_s = jnp.pad(hz_s, ((0, 0), (0, l_pad - m_tot)),
                       constant_values=_NEG_SENTINEL)
        ev_s = jnp.pad(ev_s, ((0, 0), (0, l_pad - m_tot)))
    out = pl.pallas_call(
        _cox_kernel,
        out_shape=jax.ShapeDtypeStruct((1, 1), jnp.float32),
        in_specs=[
            pl.BlockSpec((1, l_pad), lambda: (0, 0)),
            pl.BlockSpec((1, l_pad), lambda: (0, 0)),
        ],
        out_specs=pl.BlockSpec((1, 1), lambda: (0, 0)),
    )(hz_s, ev_s)
    return out[0, 0]


# ----------------------------------------------------------------------------
# Momentum module (JAX/Pallas port)
# ----------------------------------------------------------------------------
class Momentum:
    """Momentum survival framework with a Linear(D, 1) Cox backbone."""

    def __init__(self, in_features, key, batchsize=16, steps=4, rate=0.999):
        self.rate = float(rate)
        self.batchsize = int(batchsize)
        self.steps = int(steps)
        k_w, k_b = jax.random.split(key)
        bound = 1.0 / (in_features ** 0.5)       # PyTorch Linear default init
        w = jax.random.uniform(k_w, (in_features, 1), jnp.float32, -bound, bound)
        b = jax.random.uniform(k_b, (1, 1), jnp.float32, -bound, bound)
        self.w_q, self.b_q = w, b                # online (q) network
        self.w_k, self.b_k = w, b                # target (k) network (copy, no grad)
        # device-side memory_k ring buffer (capacity = batchsize * steps)
        cap = self.batchsize * self.steps
        self._k_cap = cap
        self._k_hz = jnp.full((1, cap), _NEG_SENTINEL, jnp.float32)
        self._k_ev = jnp.zeros((1, cap), jnp.float32)
        self._k_time = jnp.full((1, cap), jnp.finfo(jnp.float32).max, jnp.float32)
        self._k_step = 0                          # host-side ring pointer

    # --- public API (torch-module parity) ------------------------------------
    def online(self, x):
        return linear_forward(x, self.w_q, self.b_q).T        # (N, 1)

    def target(self, x):
        return linear_forward(x, self.w_k, self.b_k).T        # (N, 1)

    def infer(self, x):
        return self.target(x)

    # --- forward --------------------------------------------------------------
    def forward(self, inputs, event, time):
        n = inputs.shape[0]
        ev = event.astype(jnp.float32).reshape(1, n)
        tm = time.astype(jnp.float32).reshape(1, n)

        # 1) online (q) estimate, lane-major (1, N)
        online_est = linear_forward(inputs, self.w_q, self.b_q)

        # 2) memory_q holds exactly the current batch (n == batchsize);
        #    loss = Cox NPLL over [memory_k ring buffer + current online batch].
        # TODO(synk): per-sample ring semantics for memory_q when n != batchsize.
        hz_all = jnp.concatenate([self._k_hz, online_est], axis=1)
        ev_all = jnp.concatenate([self._k_ev, ev], axis=1)
        tm_all = jnp.concatenate([self._k_time, tm], axis=1)
        loss = cox_neg_partial_log_likelihood(hz_all, ev_all, tm_all)

        # 3) "no-grad" section: fused EMA update + target forward with in-place
        #    (aliased) parameter writeback.
        target_est, self.w_k, self.b_k = target_forward_and_ema(
            inputs, self.w_k, self.b_k, self.w_q, self.b_q, self.rate)

        # 4) push the target estimates into the memory_k ring buffer on device.
        off = (self._k_step * n) % self._k_cap
        self._k_hz = lax.dynamic_update_slice(self._k_hz, target_est, (0, off))
        self._k_ev = lax.dynamic_update_slice(self._k_ev, ev, (0, off))
        self._k_time = lax.dynamic_update_slice(self._k_time, tm, (0, off))
        self._k_step += 1
        return loss


# ----------------------------------------------------------------------------
# Example
# ----------------------------------------------------------------------------
if __name__ == "__main__":
    key = jax.random.PRNGKey(0)
    k_x, k_e, k_t, k_p, k_x2 = jax.random.split(key, 5)

    n, d = 8, 16
    x = jax.random.normal(k_x, (n, d), dtype=jnp.float32)
    event = jax.random.bernoulli(k_e, 0.7, (n,))
    event = event.at[0].set(True)                       # ensure >= 1 event
    # unique times -> no ties -> standard Cox partial-likelihood branch
    time = jax.random.permutation(k_t, jnp.arange(1, n + 1)).astype(jnp.float32)

    model = Momentum(in_features=d, key=k_p, batchsize=n, steps=4, rate=0.999)

    loss1 = model.forward(x, event, time)
    # second step exercises the non-empty memory_k ring-buffer path
    x2 = jax.random.normal(k_x2, (n, d), dtype=jnp.float32)
    loss2 = model.forward(x2, event, time + 0.5)        # keep times unique
    jax.block_until_ready((loss1, loss2))
    print("KERNEL_OK")
</pallas_src>

<mosaic_0001>
module attributes {stable_mosaic.version = 11 : i64} {
  func.func @_linear_kernel(%arg0: i32, %arg1: memref<16x128xf32, #tpu.memory_space<vmem>>, %arg2: memref<16x1xf32, #tpu.memory_space<vmem>>, %arg3: memref<1x1xf32, #tpu.memory_space<smem>>, %arg4: memref<1x128xf32, #tpu.memory_space<vmem>>) attributes {dimension_semantics = [#tpu.dimension_semantics<parallel>], iteration_bounds = array<i64: 1>, scalar_prefetch = 0 : i64, scratch_operands = 0 : i64, tpu.core_type = #tpu.core_type<tc>, window_params = [{transform_indices = @transform_0, window_bounds = array<i64: 16, 128>}, {pipeline_mode = #tpu.pipeline_mode<synchronous>, transform_indices = @transform_1, window_bounds = array<i64: 16, 1>}, {transform_indices = @transform_2, window_bounds = array<i64: 1, 1>}, {transform_indices = @transform_3, window_bounds = array<i64: 1, 128>}]} {
    %c0 = arith.constant 0 : index
    %c0_0 = arith.constant 0 : index
    %0 = vector.load %arg1[%c0, %c0_0] : memref<16x128xf32, #tpu.memory_space<vmem>>, vector<16x128xf32>
    %c0_1 = arith.constant 0 : index
    %c0_2 = arith.constant 0 : index
    %1 = vector.load %arg2[%c0_1, %c0_2] : memref<16x1xf32, #tpu.memory_space<vmem>>, vector<16x1xf32>
    %2 = vector.broadcast %1 : vector<16x1xf32> to vector<16x128xf32>
    %3 = arith.mulf %0, %2 : vector<16x128xf32>
    %cst = arith.constant dense<0.000000e+00> : vector<128xf32>
    %4 = vector.multi_reduction <add>, %3, %cst [0] : vector<16x128xf32> to vector<128xf32>
    %5 = vector.shape_cast %4 : vector<128xf32> to vector<1x128xf32>
    %c0_3 = arith.constant 0 : index
    %c0_4 = arith.constant 0 : index
    %6 = memref.load %arg3[%c0_3, %c0_4] : memref<1x1xf32, #tpu.memory_space<smem>>
    %7 = vector.broadcast %6 : f32 to vector<1x128xf32>
    %8 = arith.addf %5, %7 : vector<1x128xf32>
    %c0_5 = arith.constant 0 : index
    %c0_6 = arith.constant 0 : index
    %9 = vector.load %arg4[%c0_5, %c0_6] : memref<1x128xf32, #tpu.memory_space<vmem>>, vector<1x128xf32>
    tpu.vector_store %arg4[%c0_5, %c0_6], %8 {strides = array<i32>} : memref<1x128xf32, #tpu.memory_space<vmem>>, vector<1x128xf32>,
    return
  }
  func.func @transform_0(%arg0: i32) -> (i32, i32) {
    %c0_i32 = arith.constant 0 : i32
    %c0_i32_0 = arith.constant 0 : i32
    return %c0_i32, %arg0 : i32, i32
  }
  func.func @transform_1(%arg0: i32) -> (i32, i32) {
    %c0_i32 = arith.constant 0 : i32
    %c0_i32_0 = arith.constant 0 : i32
    %c0_i32_1 = arith.constant 0 : i32
    return %c0_i32, %c0_i32_0 : i32, i32
  }
  func.func @transform_2(%arg0: i32) -> (i32, i32) {
    %c0_i32 = arith.constant 0 : i32
    %c0_i32_0 = arith.constant 0 : i32
    %c0_i32_1 = arith.constant 0 : i32
    return %c0_i32, %c0_i32_0 : i32, i32
  }
  func.func @transform_3(%arg0: i32) -> (i32, i32) {
    %c0_i32 = arith.constant 0 : i32
    %c0_i32_0 = arith.constant 0 : i32
    return %c0_i32, %arg0 : i32, i32
  }
}

</mosaic_0001>

<bundles_post_ra>
// kernel: tpu_custom_call.1
= control target key start
LH: loop header
LB: loop body
LE: loop exit
PB: predicated region body
PF: predicated region fallthrough
CT: control target
= control target key end

     0   :  { %s128_s0 = inlined_call_operand.vmem [shape: f32[16,128], index: 0, kind: input, shape index: {}]   ;;  %s129_s1 = inlined_call_operand.vmem [shape: f32[16,1], index: 1, kind: input, shape index: {}]   ;;  %s130_s2 = inlined_call_operand.<no memory space> [shape: f32[1,1], index: 2, kind: input, shape index: {}]   ;;  %s131_s3 = inlined_call_operand.hbm [shape: f32[1,128], index: 3, kind: output, shape index: {}]  }
   0x1   :  { %v18_v0 = vld [vmem:[%s129_s1] sm:$0xff] }
   0x2   :  { %9 = vsyncpa [#allocation4], 0  ;;  %v88_v1 = vmov 0   ;;  %v19_v2 = vld [vmem:[%s129_s1 + $0x8] sm:$0xff]  ;;  %v16_v4 = vld [vmem:[%s128_s0] sm:$0xff]  ;;  %v40_v15 = vstv %s130_s2  ;;  %s89_s21 = smov [#allocation3]  }
   0x3   :  { %61 = vset.pattern.permute.xlu0 %v88_v1  ;;  %v17_v5 = vld [vmem:[%s128_s0 + $0x8] sm:$0xff]  ;;  %s48_s22 = sshll.u32 %s89_s21, 4  ;;  %s50_s25 = sshll.u32 %s131_s3, 4  ;;  %s49_s22 = int_to_ptr.vmem [resolvable:$true] %s48_s22  ;;  %s51_s25 = int_to_ptr.hbm [resolvable:$true] %s50_s25 }
   0x4   :  { %22 = vperm.xlu0 %61, %v18_v0  }
   0xc   :  { %27 = vperm.xlu0 %61, %v19_v2  }
  0x76   :  { %v23_v3 = vpop.permute.xlu0 %22 }
  0x77   :  { %v30_v7 = vmul.f32 %v23_v3, %v16_v4 }
  0x7e   :  { %v28_v6 = vpop.permute.xlu0 %27 }
  0x7f   :  { %v31_v8 = vmul.f32 %v28_v6, %v17_v5 }
  0x81   :  { %v32_v9 = vadd.f32 %v31_v8, %v30_v7 }
  0x83   :  { %v33_v10 = vrot.slane %v32_v9, 4 }
  0x85   :  { %v34_v11 = vadd.f32 %v33_v10, %v32_v9 }
  0x87   :  { %v35_v12 = vrot.slane %v34_v11, 2 }
  0x89   :  { %v36_v13 = vadd.f32 %v35_v12, %v34_v11 }
  0x8b   :  { %v37_v14 = vrot.slane %v36_v13, 1 }
  0x8d   :  { %v38_v16 = vadd.f32 %v37_v14, %v36_v13 }
  0x8f   :  { %v41_v17 = vadd.f32 %v40_v15, %v38_v16 }
  0x91   :  { %42 = vst [vmem:[#allocation3] sm:$0x1] %v41_v17 }
  0x92   :  { %53 = dma.vmem_to_hbm [thread:$0]  %s49_s22, 16, %s51_s25, [#allocation4]  }
  0x93   :  { %86 = dma.done.wait [#allocation4], 16  }
  0x94   :  { %87 = vsyncadd [#allocation4], 4294967280 }
  0x95   :  { %58 = vsyncpa [#allocation4], 1 }

</bundles_post_ra>
